<compile_context>
chip_gen: v5e
topology: v5e:2x2
jax: 0.10.0
libtpu: 0.0.40
codegen_flags: <defaults>
</compile_context>

<pallas_src>
import jax
import jax.numpy as jnp
from jax.experimental import pallas as pl
from jax.experimental.pallas import tpu as pltpu

LANE = 128


def _pick_tile(F, max_tile=2048):
    """Largest multiple-of-128 tile <= max_tile that divides F; else full extent."""
    if F % LANE != 0:
        return F                       # single full-extent block (allowed by Pallas)
    t = min(F, max_tile)
    t -= t % LANE
    while F % t != 0:
        t -= LANE
    return t


def _make_kernel(has_weight):
    # Kernel: out[b, :] = c[b] * v[b, :] + (1 - c[b]) * v[perm[b], :]
    #   perm_ref : (B, B) one-hot permutation matrix (f32)
    #   coeff_ref: (B, 1) per-sample mixup coefficient (f32)
    #   x_ref    : (B, TILE) lane tile of flattened X
    #   y_ref    : (B, NY)   labels          (grid-resident block)
    #   w_ref    : (B, 1)    sample weights  (grid-resident block, optional)
    def kernel(perm_ref, coeff_ref, x_ref, y_ref, *rest):
        if has_weight:
            w_ref, xo_ref, yo_ref, wo_ref = rest
        else:
            xo_ref, yo_ref = rest

        P = perm_ref[...]                               # (B, B) 0/1 matrix
        c = coeff_ref[...]                              # (B, 1) broadcasts over lanes
        one_minus = 1.0 - c

        x = x_ref[...].astype(jnp.float32)              # (B, TILE)
        x_perm = jnp.dot(P, x, preferred_element_type=jnp.float32)   # exact x[perm]
        xo_ref[...] = (c * x + one_minus * x_perm).astype(xo_ref.dtype)

        y = y_ref[...].astype(jnp.float32)              # (B, NY)
        y_perm = jnp.dot(P, y, preferred_element_type=jnp.float32)
        yo_ref[...] = (c * y + one_minus * y_perm).astype(yo_ref.dtype)

        if has_weight:
            w = w_ref[...].astype(jnp.float32)          # (B, 1)
            w_perm = jnp.dot(P, w, preferred_element_type=jnp.float32)
            wo_ref[...] = (c * w + one_minus * w_perm).astype(wo_ref.dtype)

    return kernel


def mixup2_forward(key, X, Y, weight=None, *, mix_beta, mixup2_prob):
    """Mixup2.forward — RNG in the wrapper, mixing math in a single Pallas kernel."""
    Bn = X.shape[0]
    kp, kperm, kbeta = jax.random.split(key, 3)
    p = jax.random.uniform(kp, ())
    perm = jax.random.permutation(kperm, Bn)
    coeffs = jax.random.beta(kbeta, mix_beta, mix_beta, (Bn,)).astype(jnp.float32)

    apply_mix = p < mixup2_prob
    # not applied  =>  coeff = 1, perm = identity  =>  kernel is an exact identity
    coeffs_eff = jnp.where(apply_mix, coeffs, 1.0)
    perm_eff = jnp.where(apply_mix, perm, jnp.arange(Bn))
    perm_onehot = jax.nn.one_hot(perm_eff, Bn, dtype=jnp.float32)     # (B, B)
    coeff_col = coeffs_eff.reshape(Bn, 1)

    x2d = X.reshape(Bn, -1)                  # free reshape; keep native dtype
    F = x2d.shape[1]
    ny = Y.shape[1]
    tile = _pick_tile(F)
    grid = (F // tile,)

    has_weight = weight is not None
    in_arrays = [perm_onehot, coeff_col, x2d, Y]
    in_specs = [
        pl.BlockSpec((Bn, Bn), lambda j: (0, 0)),       # one-hot perm (replicated)
        pl.BlockSpec((Bn, 1), lambda j: (0, 0)),        # coeff column (replicated)
        pl.BlockSpec((Bn, tile), lambda j: (0, j)),     # lane tile of flat(X)
        pl.BlockSpec((Bn, ny), lambda j: (0, 0)),       # Y (grid-resident)
    ]
    out_shape = [jax.ShapeDtypeStruct((Bn, F), X.dtype),
                 jax.ShapeDtypeStruct((Bn, ny), Y.dtype)]
    out_specs = [
        pl.BlockSpec((Bn, tile), lambda j: (0, j)),
        pl.BlockSpec((Bn, ny), lambda j: (0, 0)),
    ]
    if has_weight:
        in_arrays.append(weight.reshape(Bn, 1))
        in_specs.append(pl.BlockSpec((Bn, 1), lambda j: (0, 0)))
        out_shape.append(jax.ShapeDtypeStruct((Bn, 1), weight.dtype))
        out_specs.append(pl.BlockSpec((Bn, 1), lambda j: (0, 0)))

    outs = pl.pallas_call(
        _make_kernel(has_weight),
        out_shape=tuple(out_shape),
        grid=grid,
        in_specs=in_specs,
        out_specs=tuple(out_specs),
        # Y / weight output blocks are grid-resident (constant index_map), so keep the
        # feature-tile axis "arbitrary" (single-core sequential loop — mem-bound anyway).
        compiler_params=pltpu.CompilerParams(dimension_semantics=("arbitrary",)),
    )(*in_arrays)

    X_out = outs[0].reshape(X.shape)
    Y_out = outs[1]
    if not has_weight:
        return X_out, Y_out
    return X_out, Y_out, outs[2].reshape(weight.shape)


def _reference(key, X, Y, weight, mix_beta, mixup2_prob):
    """Plain-JAX reference with the exact torch formula and the same random draws."""
    Bn = X.shape[0]
    kp, kperm, kbeta = jax.random.split(key, 3)
    p = jax.random.uniform(kp, ())
    perm = jax.random.permutation(kperm, Bn)
    coeffs = jax.random.beta(kbeta, mix_beta, mix_beta, (Bn,)).astype(jnp.float32)
    apply_mix = p < mixup2_prob
    c = jnp.where(apply_mix, coeffs, 1.0)
    pm = jnp.where(apply_mix, perm, jnp.arange(Bn))
    c_x = c.reshape((Bn,) + (1,) * (X.ndim - 1))
    X_ref = c_x * X + (1.0 - c_x) * X[pm]
    Y_ref = c.reshape(-1, 1) * Y + (1.0 - c).reshape(-1, 1) * Y[pm]
    if weight is None:
        return X_ref, Y_ref
    w_ref = c * weight + (1.0 - c) * weight[pm]
    return X_ref, Y_ref, w_ref


if __name__ == "__main__":
    MIX_BETA = 1.0

    # --- Test 1: 4-D X, with weight, mixing branch taken (prob = 1.0) ---------------
    B, C, H, W = 2, 4, 16, 16
    N_CLASSES = 6
    key = jax.random.PRNGKey(0)
    kx, ky, kw, kmix = jax.random.split(key, 4)
    X = jax.random.normal(kx, (B, C, H, W), jnp.float32)
    Y = (jax.random.uniform(ky, (B, N_CLASSES)) > 0.7).astype(jnp.float32)
    weight = jax.random.uniform(kw, (B,), jnp.float32)

    X_out, Y_out, w_out = mixup2_forward(
        kmix, X, Y, weight, mix_beta=MIX_BETA, mixup2_prob=1.0)
    jax.block_until_ready((X_out, Y_out, w_out))

    X_ref, Y_ref, w_ref = _reference(kmix, X, Y, weight, MIX_BETA, 1.0)
    assert X_out.shape == X.shape and Y_out.shape == Y.shape and w_out.shape == weight.shape
    assert jnp.allclose(X_out, X_ref, atol=1e-5, rtol=1e-5)
    assert jnp.allclose(Y_out, Y_ref, atol=1e-5, rtol=1e-5)
    assert jnp.allclose(w_out, w_ref, atol=1e-5, rtol=1e-5)

    # --- Test 2: 3-D X, no weight, identity branch (prob = 0.0), unaligned F --------
    B2, T2, D2 = 2, 8, 36                                   # F = 288 (not % 128)
    k2x, k2y, k2mix = jax.random.split(jax.random.PRNGKey(1), 3)
    X2 = jax.random.normal(k2x, (B2, T2, D2), jnp.float32)
    Y2 = jax.random.uniform(k2y, (B2, N_CLASSES), jnp.float32)

    X2_out, Y2_out = mixup2_forward(k2mix, X2, Y2, mix_beta=MIX_BETA, mixup2_prob=0.0)
    jax.block_until_ready((X2_out, Y2_out))
    X2_ref, Y2_ref = _reference(k2mix, X2, Y2, None, MIX_BETA, 0.0)
    assert X2_out.shape == X2.shape and Y2_out.shape == Y2.shape
    assert jnp.allclose(X2_out, X2_ref, atol=1e-5, rtol=1e-5)
    assert jnp.allclose(Y2_out, Y2_ref, atol=1e-5, rtol=1e-5)

    print("KERNEL_OK")
</pallas_src>

<mosaic_0001>
module attributes {stable_mosaic.version = 11 : i64} {
  func.func @kernel(%arg0: i32, %arg1: memref<2x2xf32, #tpu.memory_space<vmem>>, %arg2: memref<2x1xf32, #tpu.memory_space<vmem>>, %arg3: memref<2x1024xf32, #tpu.memory_space<vmem>>, %arg4: memref<2x6xf32, #tpu.memory_space<vmem>>, %arg5: memref<2x1xf32, #tpu.memory_space<vmem>>, %arg6: memref<2x1024xf32, #tpu.memory_space<vmem>>, %arg7: memref<2x6xf32, #tpu.memory_space<vmem>>, %arg8: memref<2x1xf32, #tpu.memory_space<vmem>>) attributes {dimension_semantics = [#tpu.dimension_semantics<arbitrary>], iteration_bounds = array<i64: 1>, scalar_prefetch = 0 : i64, scratch_operands = 0 : i64, tpu.core_type = #tpu.core_type<tc>, window_params = [{pipeline_mode = #tpu.pipeline_mode<synchronous>, transform_indices = @transform_0, window_bounds = array<i64: 2, 2>}, {pipeline_mode = #tpu.pipeline_mode<synchronous>, transform_indices = @transform_1, window_bounds = array<i64: 2, 1>}, {transform_indices = @transform_2, window_bounds = array<i64: 2, 1024>}, {pipeline_mode = #tpu.pipeline_mode<synchronous>, transform_indices = @transform_3, window_bounds = array<i64: 2, 6>}, {pipeline_mode = #tpu.pipeline_mode<synchronous>, transform_indices = @transform_4, window_bounds = array<i64: 2, 1>}, {transform_indices = @transform_5, window_bounds = array<i64: 2, 1024>}, {pipeline_mode = #tpu.pipeline_mode<synchronous>, transform_indices = @transform_6, window_bounds = array<i64: 2, 6>}, {pipeline_mode = #tpu.pipeline_mode<synchronous>, transform_indices = @transform_7, window_bounds = array<i64: 2, 1>}]} {
    %c0 = arith.constant 0 : index
    %c0_0 = arith.constant 0 : index
    %0 = vector.load %arg1[%c0, %c0_0] : memref<2x2xf32, #tpu.memory_space<vmem>>, vector<2x2xf32>
    %c0_1 = arith.constant 0 : index
    %c0_2 = arith.constant 0 : index
    %1 = vector.load %arg2[%c0_1, %c0_2] : memref<2x1xf32, #tpu.memory_space<vmem>>, vector<2x1xf32>
    %cst = arith.constant 1.000000e+00 : f32
    %2 = vector.broadcast %cst : f32 to vector<2x1xf32>
    %3 = arith.subf %2, %1 : vector<2x1xf32>
    %c0_3 = arith.constant 0 : index
    %c0_4 = arith.constant 0 : index
    %4 = vector.load %arg3[%c0_3, %c0_4] : memref<2x1024xf32, #tpu.memory_space<vmem>>, vector<2x1024xf32>
    %cst_5 = arith.constant dense<0.000000e+00> : vector<2x1024xf32>
    %5 = tpu.matmul %0, %4, %cst_5 {dimension_numbers = #tpu.dot_dimension_numbers<[1], [0], [0], [1], [0, 0, 1, 1], [], []>} : vector<2x2xf32>, vector<2x1024xf32>, vector<2x1024xf32> -> vector<2x1024xf32>
    %6 = vector.broadcast %1 : vector<2x1xf32> to vector<2x1024xf32>
    %7 = arith.mulf %6, %4 : vector<2x1024xf32>
    %8 = vector.broadcast %3 : vector<2x1xf32> to vector<2x1024xf32>
    %9 = arith.mulf %8, %5 : vector<2x1024xf32>
    %10 = arith.addf %7, %9 : vector<2x1024xf32>
    %c0_6 = arith.constant 0 : index
    %c0_7 = arith.constant 0 : index
    %11 = vector.load %arg6[%c0_6, %c0_7] : memref<2x1024xf32, #tpu.memory_space<vmem>>, vector<2x1024xf32>
    tpu.vector_store %arg6[%c0_6, %c0_7], %10 {strides = array<i32>} : memref<2x1024xf32, #tpu.memory_space<vmem>>, vector<2x1024xf32>,
    %c0_8 = arith.constant 0 : index
    %c0_9 = arith.constant 0 : index
    %12 = vector.load %arg4[%c0_8, %c0_9] : memref<2x6xf32, #tpu.memory_space<vmem>>, vector<2x6xf32>
    %cst_10 = arith.constant dense<0.000000e+00> : vector<2x6xf32>
    %13 = tpu.matmul %0, %12, %cst_10 {dimension_numbers = #tpu.dot_dimension_numbers<[1], [0], [0], [1], [0, 0, 1, 1], [], []>} : vector<2x2xf32>, vector<2x6xf32>, vector<2x6xf32> -> vector<2x6xf32>
    %14 = vector.broadcast %1 : vector<2x1xf32> to vector<2x6xf32>
    %15 = arith.mulf %14, %12 : vector<2x6xf32>
    %16 = vector.broadcast %3 : vector<2x1xf32> to vector<2x6xf32>
    %17 = arith.mulf %16, %13 : vector<2x6xf32>
    %18 = arith.addf %15, %17 : vector<2x6xf32>
    %c0_11 = arith.constant 0 : index
    %c0_12 = arith.constant 0 : index
    %19 = vector.load %arg7[%c0_11, %c0_12] : memref<2x6xf32, #tpu.memory_space<vmem>>, vector<2x6xf32>
    tpu.vector_store %arg7[%c0_11, %c0_12], %18 {strides = array<i32>} : memref<2x6xf32, #tpu.memory_space<vmem>>, vector<2x6xf32>,
    %c0_13 = arith.constant 0 : index
    %c0_14 = arith.constant 0 : index
    %20 = vector.load %arg5[%c0_13, %c0_14] : memref<2x1xf32, #tpu.memory_space<vmem>>, vector<2x1xf32>
    %cst_15 = arith.constant dense<0.000000e+00> : vector<2x1xf32>
    %21 = tpu.matmul %0, %20, %cst_15 {dimension_numbers = #tpu.dot_dimension_numbers<[1], [0], [0], [1], [0, 0, 1, 1], [], []>} : vector<2x2xf32>, vector<2x1xf32>, vector<2x1xf32> -> vector<2x1xf32>
    %22 = arith.mulf %1, %20 : vector<2x1xf32>
    %23 = arith.mulf %3, %21 : vector<2x1xf32>
    %24 = arith.addf %22, %23 : vector<2x1xf32>
    %c0_16 = arith.constant 0 : index
    %c0_17 = arith.constant 0 : index
    %25 = vector.load %arg8[%c0_16, %c0_17] : memref<2x1xf32, #tpu.memory_space<vmem>>, vector<2x1xf32>
    tpu.vector_store %arg8[%c0_16, %c0_17], %24 {strides = array<i32>} : memref<2x1xf32, #tpu.memory_space<vmem>>, vector<2x1xf32>,
    return
  }
  func.func @transform_0(%arg0: i32) -> (i32, i32) {
    %c0_i32 = arith.constant 0 : i32
    %c0_i32_0 = arith.constant 0 : i32
    %c0_i32_1 = arith.constant 0 : i32
    return %c0_i32, %c0_i32_0 : i32, i32
  }
  func.func @transform_1(%arg0: i32) -> (i32, i32) {
    %c0_i32 = arith.constant 0 : i32
    %c0_i32_0 = arith.constant 0 : i32
    %c0_i32_1 = arith.constant 0 : i32
    return %c0_i32, %c0_i32_0 : i32, i32
  }
  func.func @transform_2(%arg0: i32) -> (i32, i32) {
    %c0_i32 = arith.constant 0 : i32
    %c0_i32_0 = arith.constant 0 : i32
    return %c0_i32, %arg0 : i32, i32
  }
  func.func @transform_3(%arg0: i32) -> (i32, i32) {
    %c0_i32 = arith.constant 0 : i32
    %c0_i32_0 = arith.constant 0 : i32
    %c0_i32_1 = arith.constant 0 : i32
    return %c0_i32, %c0_i32_0 : i32, i32
  }
  func.func @transform_4(%arg0: i32) -> (i32, i32) {
    %c0_i32 = arith.constant 0 : i32
    %c0_i32_0 = arith.constant 0 : i32
    %c0_i32_1 = arith.constant 0 : i32
    return %c0_i32, %c0_i32_0 : i32, i32
  }
  func.func @transform_5(%arg0: i32) -> (i32, i32) {
    %c0_i32 = arith.constant 0 : i32
    %c0_i32_0 = arith.constant 0 : i32
    return %c0_i32, %arg0 : i32, i32
  }
  func.func @transform_6(%arg0: i32) -> (i32, i32) {
    %c0_i32 = arith.constant 0 : i32
    %c0_i32_0 = arith.constant 0 : i32
    %c0_i32_1 = arith.constant 0 : i32
    return %c0_i32, %c0_i32_0 : i32, i32
  }
  func.func @transform_7(%arg0: i32) -> (i32, i32) {
    %c0_i32 = arith.constant 0 : i32
    %c0_i32_0 = arith.constant 0 : i32
    %c0_i32_1 = arith.constant 0 : i32
    return %c0_i32, %c0_i32_0 : i32, i32
  }
}

</mosaic_0001>

<bundles_post_ra>
// kernel: tpu_custom_call.1
= control target key start
LH: loop header
LB: loop body
LE: loop exit
PB: predicated region body
PF: predicated region fallthrough
CT: control target
= control target key end

     0   :  { %13 = vsyncpa [#allocation3], 0  ;;  %s625_s0 = inlined_call_operand.vmem [shape: f32[2,2], index: 0, kind: input, shape index: {}]   ;;  %s626_s1 = inlined_call_operand.vmem [shape: f32[2,1], index: 1, kind: input, shape index: {}]   ;;  %s627_s2 = inlined_call_operand.hbm [shape: f32[2,1024], index: 2, kind: input, shape index: {}]   ;;  %s628_s3 = inlined_call_operand.vmem [shape: f32[2,6], index: 3, kind: input, shape index: {}]   ;;  %s629_s4 = inlined_call_operand.vmem [shape: f32[2,1], index: 4, kind: input, shape index: {}]   ;;  %s630_s5 = inlined_call_operand.hbm [shape: f32[2,1024], index: 5, kind: output, shape index: {0}]   ;;  %s631_s6 = inlined_call_operand.hbm [shape: f32[2,6], index: 6, kind: output, shape index: {1}]   ;;  %s632_s7 = inlined_call_operand.vmem [shape: f32[2,1], index: 7, kind: output, shape index: {2}]  }
   0x1   :  { %14 = vsyncpa [#allocation4], 0 }
   0x2   :  { %15 = vsyncpa [#allocation7], 0  ;;  %s25_s26 = sshll.u32 %s627_s2, 4  ;;  %s515_s27 = smov [#allocation2]   ;;  %s26_s26 = int_to_ptr.hbm [resolvable:$true] %s25_s26 }
   0x3   :  { %s27_s28 = sshll.u32 %s515_s27, 4  ;;  %s28_s28 = int_to_ptr.vmem [resolvable:$true] %s27_s28 }
   0x4   :  { %30 = dma.hbm_to_vmem [thread:$0]  %s26_s26, 256, %s28_s28, [#allocation3]  }
   0x5   :  { %509 = dma.done.wait [#allocation3], 256  }
   0x6   :  { %510 = vsyncadd [#allocation3], 4294967040  ;;  %v516_v0 = vmov 0   ;;  %v42_v1 = vld [vmem:[#allocation2] sm:$0xff]  ;;  %v43_v2 = vld [vmem:[#allocation2 + $0x8] sm:$0xff]  ;;  %vm61_vm0 = vcmask 1041408  }
   0x7   :  { %436 = vset.pattern.permute.xlu0 %v516_v0  ;;  %46 = vst [vmem:[#allocation1] ss:$4 sm:$0xff] %v42_v1  ;;  %v565_v3 = vld [vmem:[%s626_s1] sm:$0x3]  ;;  %vm57_vm1 = vcmask 15360   ;;  %vm306_vm2 = vcmask 1045508  }
   0x8   :  { %v346_v4 = vld [vmem:[%s629_s4] sm:$0x3]  ;;  %48 = vst [vmem:[#allocation1 + $0x20] ss:$4 sm:$0xff] %v43_v2  ;;  %240 = vperm.xlu0 %436, %v565_v3   ;;  %v41_v12 = vsub.f32 1.0, %v565_v3  ;;  %vm308_vm3 = vcmask 1043456  }
   0x9   :  { %v572_v5 = vmul.f32 %v346_v4, %v565_v3  ;;  %v39_v6 = vld [vmem:[%s625_s0] sm:$0x3]  ;;  %s393_s13 = sshll.u32 %s631_s6, 4  ;;  %vm373_vm4 = vcmask 1024   ;;  %s518_s14 = smov [#allocation5]   ;;  %vm344_vm5 = vcmask 41984   ;;  %s394_s13 = int_to_ptr.hbm [resolvable:$true] %s393_s13 }
   0xa   :  { %v589_v16 = vld [vmem:[%s628_s3] sm:$0x3]  ;;  %s517_s3 = smov [#allocation6]   ;;  %s380_s15 = sshll.u32 %s518_s14, 4  ;;  %s381_s15 = int_to_ptr.vmem [resolvable:$true] %s380_s15 }
   0xb   :  { %s391_s4 = sshll.u32 %s517_s3, 4  ;;  %s382_s18 = sshll.u32 %s630_s5, 4  ;;  %s392_s4 = int_to_ptr.vmem [resolvable:$true] %s391_s4  ;;  %s383_s18 = int_to_ptr.hbm [resolvable:$true] %s382_s18 }
   0xe   :  { %v49_v7 = vld.sshfl [vmem:[#allocation1] sm:$0xff pattern:$0x73625140]  ;;  %v50_v8 = vld.sshfl [vmem:[#allocation1 + $0x8] sm:$0xff pattern:$0x73625140] }
   0xf   :  { %412 = vmatpush.msk.msra.mxu0 %vm61_vm0, %v49_v7  ;;  %414 = vmatpush.msk.msra.mxu1 %vm61_vm0, %v50_v8  ;;  %v51_v9 = vld.sshfl [vmem:[#allocation1 + $0x10] sm:$0xff pattern:$0x73625140]  ;;  %v52_v10 = vld.sshfl [vmem:[#allocation1 + $0x18] sm:$0xff pattern:$0x73625140] }
  0x10   :  { %416 = vmatpush.msk.msra.mxu2 %vm61_vm0, %v51_v9  ;;  %418 = vmatpush.msk.msra.mxu3 %vm61_vm0, %v52_v10  ;;  %243 = vst [vmem:[#allocation1] ss:$4 sm:$0xff] %v42_v1  ;;  %v55_v11 = vld.sshfl [vmem:[#allocation1 + $0x30] sm:$0xff pattern:$0x73625140] }
  0x11   :  { %413 = vmatmul.msk.f32.vlgmr.msra.gmra.mxu0 %vm57_vm1, %v39_v6  ;;  %415 = vmatmul.msk.f32.vlgmr.msra.gmra.mxu1 %vm57_vm1, %v39_v6  ;;  %v56_v13 = vld.sshfl [vmem:[#allocation1 + $0x38] sm:$0xff pattern:$0x73625140]  ;;  %v53_v14 = vld.sshfl [vmem:[#allocation1 + $0x20] sm:$0xff pattern:$0x73625140] }
  0x12   :  { %417 = vmatmul.msk.f32.vlgmr.msra.gmra.mxu2 %vm57_vm1, %v39_v6  ;;  %419 = vmatmul.msk.f32.vlgmr.msra.gmra.mxu3 %vm57_vm1, %v39_v6  ;;  %v54_v15 = vld.sshfl [vmem:[#allocation1 + $0x28] sm:$0xff pattern:$0x73625140] }
  0x13   :  { %424 = vmatpush.msk.msrb.mxu2 %vm61_vm0, %v55_v11  ;;  %426 = vmatpush.msk.msrb.mxu3 %vm61_vm0, %v56_v13  ;;  %245 = vst [vmem:[#allocation1 + $0x20] ss:$4 sm:$0xff] %v43_v2 }
  0x14   :  { %420 = vmatpush.msk.msrb.mxu0 %vm61_vm0, %v53_v14  ;;  %422 = vmatpush.msk.msrb.mxu1 %vm61_vm0, %v54_v15 }
  0x15   :  { %272 = vperm.xlu0 %436, %v41_v12  }
  0x16   :  { %428 = vmatpush.msk.msra.mxu0 %vm61_vm0, %v589_v16  ;;  %430 = vmatpush.msk.msra.mxu1 %vm61_vm0, %v346_v4 }
  0x17   :  { %v247_v19 = vld.sshfl [vmem:[#allocation1 + $0x8] sm:$0xff pattern:$0x73625140]  ;;  %v246_v22 = vld.sshfl [vmem:[#allocation1] sm:$0xff pattern:$0x73625140] }
  0x18   :  { %v248_v25 = vld.sshfl [vmem:[#allocation1 + $0x10] sm:$0xff pattern:$0x73625140]  ;;  %v249_v26 = vld.sshfl [vmem:[#allocation1 + $0x18] sm:$0xff pattern:$0x73625140] }
  0x19   :  { %421 = vmatmul.msk.f32.vlgmr.msrb.gmra.mxu0 %vm57_vm1, %v39_v6  ;;  %423 = vmatmul.msk.f32.vlgmr.msrb.gmra.mxu1 %vm57_vm1, %v39_v6 }
  0x1a   :  { %425 = vmatmul.msk.f32.vlgmr.msrb.gmra.mxu2 %vm57_vm1, %v39_v6  ;;  %427 = vmatmul.msk.f32.vlgmr.msrb.gmra.mxu3 %vm57_vm1, %v39_v6  ;;  %v251_v39 = vld.sshfl [vmem:[#allocation1 + $0x28] sm:$0xff pattern:$0x73625140]  ;;  %v252_v47 = vld.sshfl [vmem:[#allocation1 + $0x30] sm:$0xff pattern:$0x73625140] }
  0x1b   :  { %v253_v48 = vld.sshfl [vmem:[#allocation1 + $0x38] sm:$0xff pattern:$0x73625140]  ;;  %v250_v51 = vld.sshfl [vmem:[#allocation1 + $0x20] sm:$0xff pattern:$0x73625140] }
  0x21   :  { %429 = vmatmul.msk.f32.vlgmr.msra.gmra.mxu0 %vm57_vm1, %v39_v6  ;;  %431 = vmatmul.msk.f32.vlgmr.msra.gmra.mxu1 %vm57_vm1, %v39_v6 }
  0x7a   :  { %v241_v17 = vpop.permute.xlu0 %240 }
  0x7b   :  { %v263_v23 = vmul.f32 %v247_v19, %v241_v17  ;;  %v262_v27 = vmul.f32 %v246_v22, %v241_v17  ;;  %v264_v30 = vmul.f32 %v248_v25, %v241_v17  ;;  %v265_v31 = vmul.f32 %v249_v26, %v241_v17 }
  0x7c   :  { %v267_v46 = vmul.f32 %v251_v39, %v241_v17  ;;  %v268_v54 = vmul.f32 %v252_v47, %v241_v17  ;;  %v269_v59 = vmul.f32 %v253_v48, %v241_v17  ;;  %v266_v63 = vmul.f32 %v250_v51, %v241_v17 }
  0x7d   :  { %v341_v0 = vmul.f32 %v589_v16, %v241_v17 }
  0x87   :  { %v273_v18 = vpop.permute.xlu0 %272 }
  0x8e   :  { %v95_v20 = vpop.f32.mrf.mxu0  ;;  %v115_v21 = vpop.f32.mrf.mxu1 }
  0x8f   :  { %v276_v24 = vmul.f32 %v273_v18, %v115_v21  ;;  %v275_v28 = vmul.f32 %v273_v18, %v95_v20 }
  0x91   :  { %v284_v29 = vadd.f32 %v276_v24, %v263_v23  ;;  %v283_v38 = vadd.f32 %v275_v28, %v262_v27 }
  0x93   :  { %v299_v40 = vrot.slane %v284_v29, 6 }
  0x95   :  { %v135_v32 = vpop.f32.mrf.mxu2  ;;  %v155_v33 = vpop.f32.mrf.mxu3  ;;  %v305_v49 = vsel %vm61_vm0, %v283_v38, %v299_v40 }
  0x96   :  { %v277_v34 = vmul.f32 %v273_v18, %v135_v32  ;;  %v278_v35 = vmul.f32 %v273_v18, %v155_v33  ;;  %v175_v36 = vpop.f32.mrf.mxu0  ;;  %v195_v37 = vpop.f32.mrf.mxu1 }
  0x97   :  { %v280_v43 = vmul.f32 %v273_v18, %v195_v37  ;;  %v279_v57 = vmul.f32 %v273_v18, %v175_v36 }
  0x98   :  { %v285_v41 = vadd.f32 %v277_v34, %v264_v30  ;;  %v286_v42 = vadd.f32 %v278_v35, %v265_v31 }
  0x99   :  { %v288_v52 = vadd.f32 %v280_v43, %v267_v46  ;;  %v287_v3 = vadd.f32 %v279_v57, %v266_v63 }
  0x9a   :  { %v300_v44 = vrot.slane %v285_v41, 4  ;;  %v301_v45 = vrot.slane %v286_v42, 2 }
  0x9b   :  { %v302_v4 = vrot.slane %v288_v52, 6 }
  0x9c   :  { %v307_v50 = vsel %vm306_vm2, %v300_v44, %v301_v45 }
  0x9d   :  { %v215_v53 = vpop.f32.mrf.mxu2  ;;  %v235_v55 = vpop.f32.mrf.mxu3  ;;  %v309_v56 = vsel %vm308_vm3, %v305_v49, %v307_v50 }
  0x9e   :  { %v281_v58 = vmul.f32 %v273_v18, %v215_v53  ;;  %v282_v60 = vmul.f32 %v273_v18, %v235_v55  ;;  %v338_v61 = vpop.f32.mrf.mxu0  ;;  %v367_v62 = vpop.f32.mrf.mxu1  ;;  %315 = vst [vmem:[#allocation5] sm:$0xff] %v309_v56 }
  0x9f   :  { %v342_v1 = vmul.f32 %v338_v61, %v273_v18  ;;  %v371_v2 = vmul.f32 %v367_v62, %v41_v12  ;;  %v310_v12 = vsel %vm61_vm0, %v287_v3, %v302_v4 }
  0xa0   :  { %v289_v6 = vadd.f32 %v281_v58, %v268_v54  ;;  %v290_v7 = vadd.f32 %v282_v60, %v269_v59 }
  0xa1   :  { %v343_v8 = vadd.f32 %v342_v1, %v341_v0  ;;  %v372_v9 = vadd.f32 %v371_v2, %v572_v5 }
  0xa2   :  { %v303_v10 = vrot.slane %v289_v6, 4  ;;  %v304_v11 = vrot.slane %v290_v7, 2 }
  0xa3   :  { %374 = vst.msk [vmem:[%s632_s7] sm:$0x3] %vm373_vm4, %v372_v9 }
  0xa4   :  { %v311_v5 = vsel %vm306_vm2, %v303_v10, %v304_v11  ;;  %345 = vst.msk [vmem:[#allocation6] sm:$0x3] %vm344_vm5, %v343_v8 }
  0xa5   :  { %v312_v13 = vsel %vm308_vm3, %v310_v12, %v311_v5  ;;  %396 = dma.vmem_to_hbm [thread:$0]  %s392_s4, 32, %s394_s13, [#allocation7]  }
  0xa6   :  { %316 = vst [vmem:[#allocation5 + $0x8] sm:$0xff] %v312_v13 }
  0xa7   :  { %385 = dma.vmem_to_hbm [thread:$0]  %s381_s15, 256, %s383_s18, [#allocation4]  }
  0xa8   :  { %511 = dma.done.wait [#allocation4], 256  }
  0xa9   :  { %512 = vsyncadd [#allocation4], 4294967040 }
  0xaa   :  { %513 = dma.done.wait [#allocation7], 32  }
  0xab   :  { %514 = vsyncadd [#allocation7], 4294967264 }
  0xac   :  { %409 = vsyncpa [#allocation3], 1 }
  0xad   :  { %410 = vsyncpa [#allocation4], 1 }
  0xae   :  { %411 = vsyncpa [#allocation7], 1 }

</bundles_post_ra>
